<compile_context>
chip_gen: v7x
topology: tpu7x:2x2x1
jax: 0.10.0
libtpu: 0.0.40
codegen_flags: <defaults>
</compile_context>

<pallas_src>
import functools

import jax
import jax.numpy as jnp
from jax import lax
from jax.experimental import pallas as pl
from jax.experimental.pallas import tpu as pltpu


# ------------------------------ tiling helpers ------------------------------ #

_LANE = 128
_TM_MAX = 1024                    # im2col rows per tile
_TN_MAX = 512                     # output-channel tile (wide: full C for ResNet)
_TK_MAX = 2048                    # contraction tile upper bound
_VMEM_LIMIT = 48 * 1024 * 1024    # fits v7x's 64 MiB/TC with headroom


def _round_up(x, m):
    return ((x + m - 1) // m) * m


def _cdiv(a, b):
    return -(-a // b)


def _pad2d(x, rows, cols):
    r, c = x.shape
    if r == rows and c == cols:
        return x
    return jnp.pad(x, ((0, rows - r), (0, cols - c)))


def _pick_tm(M):
    # Aim for >= 2 M tiles (both v7x TensorCores get work once j collapses)
    # while keeping tiles large and sublane (8) aligned.
    nm = max(2, _cdiv(M, _TM_MAX))
    tm = _round_up(_cdiv(M, nm), 8)
    return max(8, min(_TM_MAX, tm))


def _tiles(M, K, C):
    TM = _pick_tm(M)
    M_pad = _round_up(M, TM)

    if K <= _TK_MAX:
        TK, K_pad = K, K                      # single K step, no padding waste
    else:
        nk = _cdiv(K, _TK_MAX)
        TK = _round_up(_cdiv(K, nk), 256)     # even split, MXU aligned
        K_pad = _round_up(K, TK)

    C_pad = _round_up(C, _LANE)
    if C_pad <= _TN_MAX:
        TN = C_pad                            # j axis collapses to 1
    else:
        nj = _cdiv(C_pad, _TN_MAX)
        TN = _round_up(_cdiv(C_pad, nj), _LANE)
        C_pad = TN * nj
    return TM, M_pad, TK, K_pad, TN, C_pad


# ------------------------------ Pallas kernels ------------------------------ #

def _conv_bn_kernel(a_ref, w_ref, s_ref, b_ref, o_ref, acc_ref, *, relu):
    """out = relu?((A @ W) * scale + bias); K-reduction over grid axis 2."""
    k = pl.program_id(2)

    @pl.when(k == 0)
    def _():
        acc_ref[...] = jnp.zeros_like(acc_ref)

    acc_ref[...] += jnp.dot(a_ref[...], w_ref[...],
                            preferred_element_type=jnp.float32)

    @pl.when(k == pl.num_programs(2) - 1)
    def _():
        y = acc_ref[...] * s_ref[...] + b_ref[...]
        if relu:
            y = jnp.maximum(y, 0.0)
        o_ref[...] = y.astype(o_ref.dtype)


def _conv_bn_proj_add_relu_kernel(a_ref, w_ref, s_ref, b_ref,
                                  xs_ref, ws_ref, ss_ref, bs_ref,
                                  o_ref, acc_ref, res_ref):
    """out = relu((A@W)*s + b + ((Xs@Ws)*ss + bs)).

    conv2 + bn2 fused with the 1x1 projection shortcut conv + bn.  The
    shortcut matmul runs at k==0 (overlapped with the K pipeline) into a
    second f32 scratch and is only added in the finalize step.
    """
    k = pl.program_id(2)

    @pl.when(k == 0)
    def _():
        acc_ref[...] = jnp.zeros_like(acc_ref)
        res = jnp.dot(xs_ref[...], ws_ref[...],
                      preferred_element_type=jnp.float32)
        res_ref[...] = res * ss_ref[...] + bs_ref[...]

    acc_ref[...] += jnp.dot(a_ref[...], w_ref[...],
                            preferred_element_type=jnp.float32)

    @pl.when(k == pl.num_programs(2) - 1)
    def _():
        y = acc_ref[...] * s_ref[...] + b_ref[...] + res_ref[...]
        o_ref[...] = jnp.maximum(y, 0.0).astype(o_ref.dtype)


def _conv_bn_res_add_relu_kernel(a_ref, w_ref, s_ref, b_ref, r_ref,
                                 o_ref, acc_ref):
    """out = relu((A@W)*s + b + residual); identity shortcut as a direct add."""
    k = pl.program_id(2)

    @pl.when(k == 0)
    def _():
        acc_ref[...] = jnp.zeros_like(acc_ref)

    acc_ref[...] += jnp.dot(a_ref[...], w_ref[...],
                            preferred_element_type=jnp.float32)

    @pl.when(k == pl.num_programs(2) - 1)
    def _():
        y = acc_ref[...] * s_ref[...] + b_ref[...] + r_ref[...].astype(jnp.float32)
        o_ref[...] = jnp.maximum(y, 0.0).astype(o_ref.dtype)


# ------------------------------ kernel wrappers ------------------------------ #

_DIMSEM = ("parallel", "parallel", "arbitrary")


def conv_matmul_bn(a, w, scale, bias, *, relu, out_dtype=jnp.bfloat16):
    """relu?((A @ W) * scale + bias).  Returns (M, C)."""
    M, K = a.shape
    Kw, C = w.shape
    assert K == Kw
    TM, M_pad, TK, K_pad, TN, C_pad = _tiles(M, K, C)

    a_p = _pad2d(a.astype(jnp.bfloat16), M_pad, K_pad)
    w_p = _pad2d(w.astype(jnp.bfloat16), K_pad, C_pad)
    s_p = _pad2d(scale.reshape(1, C).astype(jnp.float32), 1, C_pad)
    b_p = _pad2d(bias.reshape(1, C).astype(jnp.float32), 1, C_pad)

    out = pl.pallas_call(
        functools.partial(_conv_bn_kernel, relu=relu),
        out_shape=jax.ShapeDtypeStruct((M_pad, C_pad), out_dtype),
        grid_spec=pltpu.PrefetchScalarGridSpec(
            num_scalar_prefetch=0,
            grid=(M_pad // TM, C_pad // TN, K_pad // TK),
            in_specs=[
                pl.BlockSpec((TM, TK), lambda i, j, k: (i, k)),
                pl.BlockSpec((TK, TN), lambda i, j, k: (k, j)),
                pl.BlockSpec((1, TN), lambda i, j, k: (0, j)),
                pl.BlockSpec((1, TN), lambda i, j, k: (0, j)),
            ],
            out_specs=pl.BlockSpec((TM, TN), lambda i, j, k: (i, j)),
            scratch_shapes=[pltpu.VMEM((TM, TN), jnp.float32)],
        ),
        compiler_params=pltpu.CompilerParams(
            dimension_semantics=_DIMSEM,
            vmem_limit_bytes=_VMEM_LIMIT,
        ),
    )(a_p, w_p, s_p, b_p)
    return out[:M, :C]


def conv_matmul_bn_proj_add_relu(a, w, scale, bias, xs, ws, sscale, sbias,
                                 out_dtype=jnp.bfloat16):
    """relu((A@W)*s + b + ((Xs@Ws)*ss + bs)).  Returns (M, C)."""
    M, K = a.shape
    Kw, C = w.shape
    Ks = xs.shape[1]
    assert K == Kw and xs.shape[0] == M and ws.shape == (Ks, C)
    TM, M_pad, TK, K_pad, TN, C_pad = _tiles(M, K, C)

    a_p = _pad2d(a.astype(jnp.bfloat16), M_pad, K_pad)
    w_p = _pad2d(w.astype(jnp.bfloat16), K_pad, C_pad)
    s_p = _pad2d(scale.reshape(1, C).astype(jnp.float32), 1, C_pad)
    b_p = _pad2d(bias.reshape(1, C).astype(jnp.float32), 1, C_pad)
    xs_p = _pad2d(xs.astype(jnp.bfloat16), M_pad, Ks)
    ws_p = _pad2d(ws.astype(jnp.bfloat16), Ks, C_pad)
    ss_p = _pad2d(sscale.reshape(1, C).astype(jnp.float32), 1, C_pad)
    bs_p = _pad2d(sbias.reshape(1, C).astype(jnp.float32), 1, C_pad)

    out = pl.pallas_call(
        _conv_bn_proj_add_relu_kernel,
        out_shape=jax.ShapeDtypeStruct((M_pad, C_pad), out_dtype),
        grid_spec=pltpu.PrefetchScalarGridSpec(
            num_scalar_prefetch=0,
            grid=(M_pad // TM, C_pad // TN, K_pad // TK),
            in_specs=[
                pl.BlockSpec((TM, TK), lambda i, j, k: (i, k)),
                pl.BlockSpec((TK, TN), lambda i, j, k: (k, j)),
                pl.BlockSpec((1, TN), lambda i, j, k: (0, j)),
                pl.BlockSpec((1, TN), lambda i, j, k: (0, j)),
                pl.BlockSpec((TM, Ks), lambda i, j, k: (i, 0)),
                pl.BlockSpec((Ks, TN), lambda i, j, k: (0, j)),
                pl.BlockSpec((1, TN), lambda i, j, k: (0, j)),
                pl.BlockSpec((1, TN), lambda i, j, k: (0, j)),
            ],
            out_specs=pl.BlockSpec((TM, TN), lambda i, j, k: (i, j)),
            scratch_shapes=[pltpu.VMEM((TM, TN), jnp.float32),
                            pltpu.VMEM((TM, TN), jnp.float32)],
        ),
        compiler_params=pltpu.CompilerParams(
            dimension_semantics=_DIMSEM,
            vmem_limit_bytes=_VMEM_LIMIT,
        ),
    )(a_p, w_p, s_p, b_p, xs_p, ws_p, ss_p, bs_p)
    return out[:M, :C]


def conv_matmul_bn_res_add_relu(a, w, scale, bias, r, out_dtype=jnp.bfloat16):
    """relu((A@W)*s + b + r) with the residual added directly (no eye matmul)."""
    M, K = a.shape
    Kw, C = w.shape
    assert K == Kw and r.shape == (M, C)
    TM, M_pad, TK, K_pad, TN, C_pad = _tiles(M, K, C)

    a_p = _pad2d(a.astype(jnp.bfloat16), M_pad, K_pad)
    w_p = _pad2d(w.astype(jnp.bfloat16), K_pad, C_pad)
    s_p = _pad2d(scale.reshape(1, C).astype(jnp.float32), 1, C_pad)
    b_p = _pad2d(bias.reshape(1, C).astype(jnp.float32), 1, C_pad)
    r_p = _pad2d(r.astype(jnp.bfloat16), M_pad, C_pad)

    out = pl.pallas_call(
        _conv_bn_res_add_relu_kernel,
        out_shape=jax.ShapeDtypeStruct((M_pad, C_pad), out_dtype),
        grid_spec=pltpu.PrefetchScalarGridSpec(
            num_scalar_prefetch=0,
            grid=(M_pad // TM, C_pad // TN, K_pad // TK),
            in_specs=[
                pl.BlockSpec((TM, TK), lambda i, j, k: (i, k)),
                pl.BlockSpec((TK, TN), lambda i, j, k: (k, j)),
                pl.BlockSpec((1, TN), lambda i, j, k: (0, j)),
                pl.BlockSpec((1, TN), lambda i, j, k: (0, j)),
                pl.BlockSpec((TM, TN), lambda i, j, k: (i, j)),
            ],
            out_specs=pl.BlockSpec((TM, TN), lambda i, j, k: (i, j)),
            scratch_shapes=[pltpu.VMEM((TM, TN), jnp.float32)],
        ),
        compiler_params=pltpu.CompilerParams(
            dimension_semantics=_DIMSEM,
            vmem_limit_bytes=_VMEM_LIMIT,
        ),
    )(a_p, w_p, s_p, b_p, r_p)
    return out[:M, :C]


# -------------------------------- JAX glue ---------------------------------- #

def im2col_3x3(x_nhwc, stride):
    """3x3, padding=1 patch extraction (data-movement glue, bf16)."""
    N, H, W, C = x_nhwc.shape
    Ho = (H + 2 - 3) // stride + 1
    Wo = (W + 2 - 3) // stride + 1
    xp = jnp.pad(x_nhwc, ((0, 0), (1, 1), (1, 1), (0, 0)))
    cols = []
    for dy in range(3):
        for dx in range(3):
            patch = lax.slice(
                xp,
                (0, dy, dx, 0),
                (N, dy + (Ho - 1) * stride + 1, dx + (Wo - 1) * stride + 1, C),
                (1, stride, stride, 1),
            )
            cols.append(patch)
    cols = jnp.concatenate(cols, axis=-1)          # (N, Ho, Wo, 9*C)
    return cols.reshape(N * Ho * Wo, 9 * C), (Ho, Wo)


def basic_block_forward(x_nchw, params, stride):
    """Pallas implementation of BasicBlock.forward (NCHW in, NCHW out)."""
    x = jnp.transpose(x_nchw, (0, 2, 3, 1)).astype(jnp.bfloat16)   # NHWC, bf16
    N, H, W, cin = x.shape
    planes = params["w1"].shape[-1]

    # conv1 (3x3, stride) + bn1 + relu
    a1, (Ho, Wo) = im2col_3x3(x, stride)
    w1 = params["w1"].reshape(9 * cin, planes)
    out1 = conv_matmul_bn(a1, w1, params["s1"], params["b1"],
                          relu=True, out_dtype=jnp.bfloat16)        # (M, planes)
    out1_img = out1.reshape(N, Ho, Wo, planes)

    # conv2 (3x3, stride 1) + bn2 + shortcut + add + relu (single fused kernel)
    a2, _ = im2col_3x3(out1_img, 1)
    w2 = params["w2"].reshape(9 * planes, planes)

    if stride != 1 or cin != planes:
        # projection shortcut: 1x1 conv + bn fused into the kernel
        xs = x[:, ::stride, ::stride, :].reshape(N * Ho * Wo, cin)
        ws = params["ws"].reshape(cin, planes)
        out = conv_matmul_bn_proj_add_relu(
            a2, w2, params["s2"], params["b2"],
            xs, ws, params["ss"], params["bs"], out_dtype=jnp.bfloat16)
    else:
        # identity shortcut: residual added directly in the epilogue
        r = x.reshape(N * Ho * Wo, cin)
        out = conv_matmul_bn_res_add_relu(
            a2, w2, params["s2"], params["b2"], r, out_dtype=jnp.bfloat16)

    out = out.reshape(N, Ho, Wo, planes)
    return jnp.transpose(out, (0, 3, 1, 2)).astype(jnp.float32)     # -> NCHW f32


# ---------------------------- pure-JAX reference ----------------------------- #

def ref_forward(x_nchw, params, stride):
    x = jnp.transpose(x_nchw, (0, 2, 3, 1)).astype(jnp.float32)

    def conv(inp, w, s, pad):
        return lax.conv_general_dilated(
            inp, w, (s, s), pad,
            dimension_numbers=("NHWC", "HWIO", "NHWC"),
            precision=lax.Precision.HIGHEST)

    out = conv(x, params["w1"], stride, [(1, 1), (1, 1)])
    out = out * params["s1"] + params["b1"]
    out = jnp.maximum(out, 0.0)
    out = conv(out, params["w2"], 1, [(1, 1), (1, 1)])
    out = out * params["s2"] + params["b2"]
    cin, planes = params["w1"].shape[2], params["w1"].shape[3]
    if stride != 1 or cin != planes:
        sc = conv(x, params["ws"].reshape(1, 1, cin, planes), stride,
                  [(0, 0), (0, 0)])
        sc = sc * params["ss"] + params["bs"]
    else:
        sc = x
    out = jnp.maximum(out + sc, 0.0)
    return jnp.transpose(out, (0, 3, 1, 2))


# ---------------------------------- init ------------------------------------ #

def init_params(key, in_planes, planes, stride, eps=1e-5):
    ks = jax.random.split(key, 10)

    def bn_affine(kg, kb, c):
        gamma = 1.0 + 0.1 * jax.random.normal(kg, (c,), jnp.float32)
        beta = 0.1 * jax.random.normal(kb, (c,), jnp.float32)
        running_mean = jnp.zeros((c,), jnp.float32)
        running_var = jnp.ones((c,), jnp.float32)
        scale = gamma / jnp.sqrt(running_var + eps)
        bias = beta - running_mean * scale
        return scale, bias

    p = {}
    p["w1"] = 0.2 * jax.random.normal(ks[0], (3, 3, in_planes, planes), jnp.float32)
    p["s1"], p["b1"] = bn_affine(ks[1], ks[2], planes)
    p["w2"] = 0.2 * jax.random.normal(ks[3], (3, 3, planes, planes), jnp.float32)
    p["s2"], p["b2"] = bn_affine(ks[4], ks[5], planes)
    if stride != 1 or in_planes != planes:
        p["ws"] = 0.2 * jax.random.normal(ks[6], (1, 1, in_planes, planes), jnp.float32)
        p["ss"], p["bs"] = bn_affine(ks[7], ks[8], planes)
    return p


# ---------------------------------- main ------------------------------------ #

if __name__ == "__main__":
    N, in_planes, H, W = 2, 4, 16, 16
    planes = 8

    key = jax.random.PRNGKey(0)
    kx, kp1, kp2 = jax.random.split(key, 3)
    x = jax.random.normal(kx, (N, in_planes, H, W), jnp.float32)    # NCHW input

    # Block 1: projection shortcut (stride 2, 4 -> 8 channels).
    params1 = init_params(kp1, in_planes, planes, stride=2)
    # Block 2: identity shortcut (stride 1, 8 -> 8 channels).
    params2 = init_params(kp2, planes, planes, stride=1)

    @jax.jit
    def fwd(xx, p1, p2):
        y = basic_block_forward(xx, p1, stride=2)
        return basic_block_forward(y, p2, stride=1)

    out = jax.block_until_ready(fwd(x, params1, params2))

    ref = ref_forward(ref_forward(x, params1, 2), params2, 1)
    ref = jax.block_until_ready(ref)

    assert out.shape == (N, planes, H // 2, W // 2), out.shape
    # Tolerance accounts for bf16 MXU inputs / bf16 intermediates (f32 accumulation).
    max_err = float(jnp.max(jnp.abs(out - ref)))
    assert jnp.allclose(out, ref, atol=1e-1, rtol=1e-1), max_err

    print("KERNEL_OK")
</pallas_src>

<mosaic_0001>
module attributes {stable_mosaic.version = 11 : i64} {
  func.func @_conv_bn_kernel(%arg0: i32, %arg1: i32, %arg2: i32, %arg3: memref<64x36xbf16, #tpu.memory_space<vmem>>, %arg4: memref<36x128xbf16, #tpu.memory_space<vmem>>, %arg5: memref<1x128xf32, #tpu.memory_space<vmem>>, %arg6: memref<1x128xf32, #tpu.memory_space<vmem>>, %arg7: memref<64x128xbf16, #tpu.memory_space<vmem>>, %arg8: memref<64x128xf32, #tpu.memory_space<vmem>>) attributes {dimension_semantics = [#tpu.dimension_semantics<parallel>, #tpu.dimension_semantics<parallel>, #tpu.dimension_semantics<arbitrary>], iteration_bounds = array<i64: 2, 1, 1>, scalar_prefetch = 0 : i64, scratch_operands = 1 : i64, tpu.core_type = #tpu.core_type<tc>, window_params = [{transform_indices = @transform_0, window_bounds = array<i64: 64, 36>}, {transform_indices = @transform_1, window_bounds = array<i64: 36, 128>}, {transform_indices = @transform_2, window_bounds = array<i64: 1, 128>}, {transform_indices = @transform_3, window_bounds = array<i64: 1, 128>}, {transform_indices = @transform_4, window_bounds = array<i64: 64, 128>}]} {
    %c0_i32 = arith.constant 0 : i32
    %0 = arith.cmpi eq, %arg2, %c0_i32 : i32
    %1 = arith.extui %0 : i1 to i32
    %c0_i32_0 = arith.constant 0 : i32
    %2 = arith.cmpi ne, %1, %c0_i32_0 : i32
    scf.if %2 {
      %cst_10 = arith.constant 0.000000e+00 : f32
      %12 = vector.broadcast %cst_10 : f32 to vector<64x128xf32>
      %c0_11 = arith.constant 0 : index
      %c0_12 = arith.constant 0 : index
      %13 = vector.load %arg8[%c0_11, %c0_12] : memref<64x128xf32, #tpu.memory_space<vmem>>, vector<64x128xf32>
      tpu.vector_store %arg8[%c0_11, %c0_12], %12 {strides = array<i32>} : memref<64x128xf32, #tpu.memory_space<vmem>>, vector<64x128xf32>,
    } else {
    }
    %c0 = arith.constant 0 : index
    %c0_1 = arith.constant 0 : index
    %3 = vector.load %arg8[%c0, %c0_1] : memref<64x128xf32, #tpu.memory_space<vmem>>, vector<64x128xf32>
    %c0_2 = arith.constant 0 : index
    %c0_3 = arith.constant 0 : index
    %4 = vector.load %arg3[%c0_2, %c0_3] : memref<64x36xbf16, #tpu.memory_space<vmem>>, vector<64x36xbf16>
    %c0_4 = arith.constant 0 : index
    %c0_5 = arith.constant 0 : index
    %5 = vector.load %arg4[%c0_4, %c0_5] : memref<36x128xbf16, #tpu.memory_space<vmem>>, vector<36x128xbf16>
    %cst = arith.constant dense<0.000000e+00> : vector<64x128xf32>
    %6 = tpu.matmul %4, %5, %cst {dimension_numbers = #tpu.dot_dimension_numbers<[1], [0], [0], [1], [0, 0, 1, 1], [], []>} : vector<64x36xbf16>, vector<36x128xbf16>, vector<64x128xf32> -> vector<64x128xf32>
    %7 = arith.addf %3, %6 : vector<64x128xf32>
    %c0_6 = arith.constant 0 : index
    %c0_7 = arith.constant 0 : index
    %8 = vector.load %arg8[%c0_6, %c0_7] : memref<64x128xf32, #tpu.memory_space<vmem>>, vector<64x128xf32>
    tpu.vector_store %arg8[%c0_6, %c0_7], %7 {strides = array<i32>} : memref<64x128xf32, #tpu.memory_space<vmem>>, vector<64x128xf32>,
    %c0_i32_8 = arith.constant 0 : i32
    %9 = arith.cmpi eq, %arg2, %c0_i32_8 : i32
    %10 = arith.extui %9 : i1 to i32
    %c0_i32_9 = arith.constant 0 : i32
    %11 = arith.cmpi ne, %10, %c0_i32_9 : i32
    scf.if %11 {
      %c0_10 = arith.constant 0 : index
      %c0_11 = arith.constant 0 : index
      %12 = vector.load %arg8[%c0_10, %c0_11] : memref<64x128xf32, #tpu.memory_space<vmem>>, vector<64x128xf32>
      %c0_12 = arith.constant 0 : index
      %c0_13 = arith.constant 0 : index
      %13 = vector.load %arg5[%c0_12, %c0_13] : memref<1x128xf32, #tpu.memory_space<vmem>>, vector<1x128xf32>
      %14 = vector.broadcast %13 : vector<1x128xf32> to vector<64x128xf32>
      %15 = arith.mulf %12, %14 : vector<64x128xf32>
      %c0_14 = arith.constant 0 : index
      %c0_15 = arith.constant 0 : index
      %16 = vector.load %arg6[%c0_14, %c0_15] : memref<1x128xf32, #tpu.memory_space<vmem>>, vector<1x128xf32>
      %17 = vector.broadcast %16 : vector<1x128xf32> to vector<64x128xf32>
      %18 = arith.addf %15, %17 : vector<64x128xf32>
      %cst_16 = arith.constant 0.000000e+00 : f32
      %19 = vector.broadcast %cst_16 : f32 to vector<64x128xf32>
      %20 = arith.maximumf %18, %19 : vector<64x128xf32>
      %21 = arith.truncf %20 : vector<64x128xf32> to vector<64x128xbf16>
      %c0_17 = arith.constant 0 : index
      %c0_18 = arith.constant 0 : index
      %22 = vector.load %arg7[%c0_17, %c0_18] : memref<64x128xbf16, #tpu.memory_space<vmem>>, vector<64x128xbf16>
      tpu.vector_store %arg7[%c0_17, %c0_18], %21 {strides = array<i32>} : memref<64x128xbf16, #tpu.memory_space<vmem>>, vector<64x128xbf16>,
    } else {
    }
    return
  }
  func.func @transform_0(%arg0: i32, %arg1: i32, %arg2: i32) -> (i32, i32) {
    %c0_i32 = arith.constant 0 : i32
    return %arg0, %arg2 : i32, i32
  }
  func.func @transform_1(%arg0: i32, %arg1: i32, %arg2: i32) -> (i32, i32) {
    %c0_i32 = arith.constant 0 : i32
    return %arg2, %arg1 : i32, i32
  }
  func.func @transform_2(%arg0: i32, %arg1: i32, %arg2: i32) -> (i32, i32) {
    %c0_i32 = arith.constant 0 : i32
    %c0_i32_0 = arith.constant 0 : i32
    return %c0_i32, %arg1 : i32, i32
  }
  func.func @transform_3(%arg0: i32, %arg1: i32, %arg2: i32) -> (i32, i32) {
    %c0_i32 = arith.constant 0 : i32
    %c0_i32_0 = arith.constant 0 : i32
    return %c0_i32, %arg1 : i32, i32
  }
  func.func @transform_4(%arg0: i32, %arg1: i32, %arg2: i32) -> (i32, i32) {
    %c0_i32 = arith.constant 0 : i32
    return %arg0, %arg1 : i32, i32
  }
}

module attributes {stable_mosaic.version = 11 : i64} {
  func.func @_conv_bn_proj_add_relu_kernel(%arg0: i32, %arg1: i32, %arg2: i32, %arg3: memref<64x72xbf16, #tpu.memory_space<vmem>>, %arg4: memref<72x128xbf16, #tpu.memory_space<vmem>>, %arg5: memref<1x128xf32, #tpu.memory_space<vmem>>, %arg6: memref<1x128xf32, #tpu.memory_space<vmem>>, %arg7: memref<64x4xbf16, #tpu.memory_space<vmem>>, %arg8: memref<4x128xbf16, #tpu.memory_space<vmem>>, %arg9: memref<1x128xf32, #tpu.memory_space<vmem>>, %arg10: memref<1x128xf32, #tpu.memory_space<vmem>>, %arg11: memref<64x128xbf16, #tpu.memory_space<vmem>>, %arg12: memref<64x128xf32, #tpu.memory_space<vmem>>, %arg13: memref<64x128xf32, #tpu.memory_space<vmem>>) attributes {dimension_semantics = [#tpu.dimension_semantics<parallel>, #tpu.dimension_semantics<parallel>, #tpu.dimension_semantics<arbitrary>], iteration_bounds = array<i64: 2, 1, 1>, scalar_prefetch = 0 : i64, scratch_operands = 2 : i64, tpu.core_type = #tpu.core_type<tc>, window_params = [{transform_indices = @transform_0, window_bounds = array<i64: 64, 72>}, {transform_indices = @transform_1, window_bounds = array<i64: 72, 128>}, {transform_indices = @transform_2, window_bounds = array<i64: 1, 128>}, {transform_indices = @transform_3, window_bounds = array<i64: 1, 128>}, {transform_indices = @transform_4, window_bounds = array<i64: 64, 4>}, {transform_indices = @transform_5, window_bounds = array<i64: 4, 128>}, {transform_indices = @transform_6, window_bounds = array<i64: 1, 128>}, {transform_indices = @transform_7, window_bounds = array<i64: 1, 128>}, {transform_indices = @transform_8, window_bounds = array<i64: 64, 128>}]} {
    %c0_i32 = arith.constant 0 : i32
    %0 = arith.cmpi eq, %arg2, %c0_i32 : i32
    %1 = arith.extui %0 : i1 to i32
    %c0_i32_0 = arith.constant 0 : i32
    %2 = arith.cmpi ne, %1, %c0_i32_0 : i32
    scf.if %2 {
      %cst_10 = arith.constant 0.000000e+00 : f32
      %12 = vector.broadcast %cst_10 : f32 to vector<64x128xf32>
      %c0_11 = arith.constant 0 : index
      %c0_12 = arith.constant 0 : index
      %13 = vector.load %arg12[%c0_11, %c0_12] : memref<64x128xf32, #tpu.memory_space<vmem>>, vector<64x128xf32>
      tpu.vector_store %arg12[%c0_11, %c0_12], %12 {strides = array<i32>} : memref<64x128xf32, #tpu.memory_space<vmem>>, vector<64x128xf32>,
      %c0_13 = arith.constant 0 : index
      %c0_14 = arith.constant 0 : index
      %14 = vector.load %arg7[%c0_13, %c0_14] : memref<64x4xbf16, #tpu.memory_space<vmem>>, vector<64x4xbf16>
      %c0_15 = arith.constant 0 : index
      %c0_16 = arith.constant 0 : index
      %15 = vector.load %arg8[%c0_15, %c0_16] : memref<4x128xbf16, #tpu.memory_space<vmem>>, vector<4x128xbf16>
      %cst_17 = arith.constant dense<0.000000e+00> : vector<64x128xf32>
      %16 = tpu.matmul %14, %15, %cst_17 {dimension_numbers = #tpu.dot_dimension_numbers<[1], [0], [0], [1], [0, 0, 1, 1], [], []>} : vector<64x4xbf16>, vector<4x128xbf16>, vector<64x128xf32> -> vector<64x128xf32>
      %c0_18 = arith.constant 0 : index
      %c0_19 = arith.constant 0 : index
      %17 = vector.load %arg9[%c0_18, %c0_19] : memref<1x128xf32, #tpu.memory_space<vmem>>, vector<1x128xf32>
      %18 = vector.broadcast %17 : vector<1x128xf32> to vector<64x128xf32>
      %19 = arith.mulf %16, %18 : vector<64x128xf32>
      %c0_20 = arith.constant 0 : index
      %c0_21 = arith.constant 0 : index
      %20 = vector.load %arg10[%c0_20, %c0_21] : memref<1x128xf32, #tpu.memory_space<vmem>>, vector<1x128xf32>
      %21 = vector.broadcast %20 : vector<1x128xf32> to vector<64x128xf32>
      %22 = arith.addf %19, %21 : vector<64x128xf32>
      %c0_22 = arith.constant 0 : index
      %c0_23 = arith.constant 0 : index
      %23 = vector.load %arg13[%c0_22, %c0_23] : memref<64x128xf32, #tpu.memory_space<vmem>>, vector<64x128xf32>
      tpu.vector_store %arg13[%c0_22, %c0_23], %22 {strides = array<i32>} : memref<64x128xf32, #tpu.memory_space<vmem>>, vector<64x128xf32>,
    } else {
    }
    %c0 = arith.constant 0 : index
    %c0_1 = arith.constant 0 : index
    %3 = vector.load %arg12[%c0, %c0_1] : memref<64x128xf32, #tpu.memory_space<vmem>>, vector<64x128xf32>
    %c0_2 = arith.constant 0 : index
    %c0_3 = arith.constant 0 : index
    %4 = vector.load %arg3[%c0_2, %c0_3] : memref<64x72xbf16, #tpu.memory_space<vmem>>, vector<64x72xbf16>
    %c0_4 = arith.constant 0 : index
    %c0_5 = arith.constant 0 : index
    %5 = vector.load %arg4[%c0_4, %c0_5] : memref<72x128xbf16, #tpu.memory_space<vmem>>, vector<72x128xbf16>
    %cst = arith.constant dense<0.000000e+00> : vector<64x128xf32>
    %6 = tpu.matmul %4, %5, %cst {dimension_numbers = #tpu.dot_dimension_numbers<[1], [0], [0], [1], [0, 0, 1, 1], [], []>} : vector<64x72xbf16>, vector<72x128xbf16>, vector<64x128xf32> -> vector<64x128xf32>
    %7 = arith.addf %3, %6 : vector<64x128xf32>
    %c0_6 = arith.constant 0 : index
    %c0_7 = arith.constant 0 : index
    %8 = vector.load %arg12[%c0_6, %c0_7] : memref<64x128xf32, #tpu.memory_space<vmem>>, vector<64x128xf32>
    tpu.vector_store %arg12[%c0_6, %c0_7], %7 {strides = array<i32>} : memref<64x128xf32, #tpu.memory_space<vmem>>, vector<64x128xf32>,
    %c0_i32_8 = arith.constant 0 : i32
    %9 = arith.cmpi eq, %arg2, %c0_i32_8 : i32
    %10 = arith.extui %9 : i1 to i32
    %c0_i32_9 = arith.constant 0 : i32
    %11 = arith.cmpi ne, %10, %c0_i32_9 : i32
    scf.if %11 {
      %c0_10 = arith.constant 0 : index
      %c0_11 = arith.constant 0 : index
      %12 = vector.load %arg12[%c0_10, %c0_11] : memref<64x128xf32, #tpu.memory_space<vmem>>, vector<64x128xf32>
      %c0_12 = arith.constant 0 : index
      %c0_13 = arith.constant 0 : index
      %13 = vector.load %arg5[%c0_12, %c0_13] : memref<1x128xf32, #tpu.memory_space<vmem>>, vector<1x128xf32>
      %14 = vector.broadcast %13 : vector<1x128xf32> to vector<64x128xf32>
      %15 = arith.mulf %12, %14 : vector<64x128xf32>
      %c0_14 = arith.constant 0 : index
      %c0_15 = arith.constant 0 : index
      %16 = vector.load %arg6[%c0_14, %c0_15] : memref<1x128xf32, #tpu.memory_space<vmem>>, vector<1x128xf32>
      %17 = vector.broadcast %16 : vector<1x128xf32> to vector<64x128xf32>
      %18 = arith.addf %15, %17 : vector<64x128xf32>
      %c0_16 = arith.constant 0 : index
      %c0_17 = arith.constant 0 : index
      %19 = vector.load %arg13[%c0_16, %c0_17] : memref<64x128xf32, #tpu.memory_space<vmem>>, vector<64x128xf32>
      %20 = arith.addf %18, %19 : vector<64x128xf32>
      %cst_18 = arith.constant 0.000000e+00 : f32
      %21 = vector.broadcast %cst_18 : f32 to vector<64x128xf32>
      %22 = arith.maximumf %20, %21 : vector<64x128xf32>
      %23 = arith.truncf %22 : vector<64x128xf32> to vector<64x128xbf16>
      %c0_19 = arith.constant 0 : index
      %c0_20 = arith.constant 0 : index
      %24 = vector.load %arg11[%c0_19, %c0_20] : memref<64x128xbf16, #tpu.memory_space<vmem>>, vector<64x128xbf16>
      tpu.vector_store %arg11[%c0_19, %c0_20], %23 {strides = array<i32>} : memref<64x128xbf16, #tpu.memory_space<vmem>>, vector<64x128xbf16>,
    } else {
    }
    return
  }
  func.func @transform_0(%arg0: i32, %arg1: i32, %arg2: i32) -> (i32, i32) {
    %c0_i32 = arith.constant 0 : i32
    return %arg0, %arg2 : i32, i32
  }
  func.func @transform_1(%arg0: i32, %arg1: i32, %arg2: i32) -> (i32, i32) {
    %c0_i32 = arith.constant 0 : i32
    return %arg2, %arg1 : i32, i32
  }
  func.func @transform_2(%arg0: i32, %arg1: i32, %arg2: i32) -> (i32, i32) {
    %c0_i32 = arith.constant 0 : i32
    %c0_i32_0 = arith.constant 0 : i32
    return %c0_i32, %arg1 : i32, i32
  }
  func.func @transform_3(%arg0: i32, %arg1: i32, %arg2: i32) -> (i32, i32) {
    %c0_i32 = arith.constant 0 : i32
    %c0_i32_0 = arith.constant 0 : i32
    return %c0_i32, %arg1 : i32, i32
  }
  func.func @transform_4(%arg0: i32, %arg1: i32, %arg2: i32) -> (i32, i32) {
    %c0_i32 = arith.constant 0 : i32
    %c0_i32_0 = arith.constant 0 : i32
    return %arg0, %c0_i32 : i32, i32
  }
  func.func @transform_5(%arg0: i32, %arg1: i32, %arg2: i32) -> (i32, i32) {
    %c0_i32 = arith.constant 0 : i32
    %c0_i32_0 = arith.constant 0 : i32
    return %c0_i32, %arg1 : i32, i32
  }
  func.func @transform_6(%arg0: i32, %arg1: i32, %arg2: i32) -> (i32, i32) {
    %c0_i32 = arith.constant 0 : i32
    %c0_i32_0 = arith.constant 0 : i32
    return %c0_i32, %arg1 : i32, i32
  }
  func.func @transform_7(%arg0: i32, %arg1: i32, %arg2: i32) -> (i32, i32) {
    %c0_i32 = arith.constant 0 : i32
    %c0_i32_0 = arith.constant 0 : i32
    return %c0_i32, %arg1 : i32, i32
  }
  func.func @transform_8(%arg0: i32, %arg1: i32, %arg2: i32) -> (i32, i32) {
    %c0_i32 = arith.constant 0 : i32
    return %arg0, %arg1 : i32, i32
  }
}

module attributes {stable_mosaic.version = 11 : i64} {
  func.func @_conv_bn_kernel(%arg0: i32, %arg1: i32, %arg2: i32, %arg3: memref<64x72xbf16, #tpu.memory_space<vmem>>, %arg4: memref<72x128xbf16, #tpu.memory_space<vmem>>, %arg5: memref<1x128xf32, #tpu.memory_space<vmem>>, %arg6: memref<1x128xf32, #tpu.memory_space<vmem>>, %arg7: memref<64x128xbf16, #tpu.memory_space<vmem>>, %arg8: memref<64x128xf32, #tpu.memory_space<vmem>>) attributes {dimension_semantics = [#tpu.dimension_semantics<parallel>, #tpu.dimension_semantics<parallel>, #tpu.dimension_semantics<arbitrary>], iteration_bounds = array<i64: 2, 1, 1>, scalar_prefetch = 0 : i64, scratch_operands = 1 : i64, tpu.core_type = #tpu.core_type<tc>, window_params = [{transform_indices = @transform_0, window_bounds = array<i64: 64, 72>}, {transform_indices = @transform_1, window_bounds = array<i64: 72, 128>}, {transform_indices = @transform_2, window_bounds = array<i64: 1, 128>}, {transform_indices = @transform_3, window_bounds = array<i64: 1, 128>}, {transform_indices = @transform_4, window_bounds = array<i64: 64, 128>}]} {
    %c0_i32 = arith.constant 0 : i32
    %0 = arith.cmpi eq, %arg2, %c0_i32 : i32
    %1 = arith.extui %0 : i1 to i32
    %c0_i32_0 = arith.constant 0 : i32
    %2 = arith.cmpi ne, %1, %c0_i32_0 : i32
    scf.if %2 {
      %cst_10 = arith.constant 0.000000e+00 : f32
      %12 = vector.broadcast %cst_10 : f32 to vector<64x128xf32>
      %c0_11 = arith.constant 0 : index
      %c0_12 = arith.constant 0 : index
      %13 = vector.load %arg8[%c0_11, %c0_12] : memref<64x128xf32, #tpu.memory_space<vmem>>, vector<64x128xf32>
      tpu.vector_store %arg8[%c0_11, %c0_12], %12 {strides = array<i32>} : memref<64x128xf32, #tpu.memory_space<vmem>>, vector<64x128xf32>,
    } else {
    }
    %c0 = arith.constant 0 : index
    %c0_1 = arith.constant 0 : index
    %3 = vector.load %arg8[%c0, %c0_1] : memref<64x128xf32, #tpu.memory_space<vmem>>, vector<64x128xf32>
    %c0_2 = arith.constant 0 : index
    %c0_3 = arith.constant 0 : index
    %4 = vector.load %arg3[%c0_2, %c0_3] : memref<64x72xbf16, #tpu.memory_space<vmem>>, vector<64x72xbf16>
    %c0_4 = arith.constant 0 : index
    %c0_5 = arith.constant 0 : index
    %5 = vector.load %arg4[%c0_4, %c0_5] : memref<72x128xbf16, #tpu.memory_space<vmem>>, vector<72x128xbf16>
    %cst = arith.constant dense<0.000000e+00> : vector<64x128xf32>
    %6 = tpu.matmul %4, %5, %cst {dimension_numbers = #tpu.dot_dimension_numbers<[1], [0], [0], [1], [0, 0, 1, 1], [], []>} : vector<64x72xbf16>, vector<72x128xbf16>, vector<64x128xf32> -> vector<64x128xf32>
    %7 = arith.addf %3, %6 : vector<64x128xf32>
    %c0_6 = arith.constant 0 : index
    %c0_7 = arith.constant 0 : index
    %8 = vector.load %arg8[%c0_6, %c0_7] : memref<64x128xf32, #tpu.memory_space<vmem>>, vector<64x128xf32>
    tpu.vector_store %arg8[%c0_6, %c0_7], %7 {strides = array<i32>} : memref<64x128xf32, #tpu.memory_space<vmem>>, vector<64x128xf32>,
    %c0_i32_8 = arith.constant 0 : i32
    %9 = arith.cmpi eq, %arg2, %c0_i32_8 : i32
    %10 = arith.extui %9 : i1 to i32
    %c0_i32_9 = arith.constant 0 : i32
    %11 = arith.cmpi ne, %10, %c0_i32_9 : i32
    scf.if %11 {
      %c0_10 = arith.constant 0 : index
      %c0_11 = arith.constant 0 : index
      %12 = vector.load %arg8[%c0_10, %c0_11] : memref<64x128xf32, #tpu.memory_space<vmem>>, vector<64x128xf32>
      %c0_12 = arith.constant 0 : index
      %c0_13 = arith.constant 0 : index
      %13 = vector.load %arg5[%c0_12, %c0_13] : memref<1x128xf32, #tpu.memory_space<vmem>>, vector<1x128xf32>
      %14 = vector.broadcast %13 : vector<1x128xf32> to vector<64x128xf32>
      %15 = arith.mulf %12, %14 : vector<64x128xf32>
      %c0_14 = arith.constant 0 : index
      %c0_15 = arith.constant 0 : index
      %16 = vector.load %arg6[%c0_14, %c0_15] : memref<1x128xf32, #tpu.memory_space<vmem>>, vector<1x128xf32>
      %17 = vector.broadcast %16 : vector<1x128xf32> to vector<64x128xf32>
      %18 = arith.addf %15, %17 : vector<64x128xf32>
      %cst_16 = arith.constant 0.000000e+00 : f32
      %19 = vector.broadcast %cst_16 : f32 to vector<64x128xf32>
      %20 = arith.maximumf %18, %19 : vector<64x128xf32>
      %21 = arith.truncf %20 : vector<64x128xf32> to vector<64x128xbf16>
      %c0_17 = arith.constant 0 : index
      %c0_18 = arith.constant 0 : index
      %22 = vector.load %arg7[%c0_17, %c0_18] : memref<64x128xbf16, #tpu.memory_space<vmem>>, vector<64x128xbf16>
      tpu.vector_store %arg7[%c0_17, %c0_18], %21 {strides = array<i32>} : memref<64x128xbf16, #tpu.memory_space<vmem>>, vector<64x128xbf16>,
    } else {
    }
    return
  }
  func.func @transform_0(%arg0: i32, %arg1: i32, %arg2: i32) -> (i32, i32) {
    %c0_i32 = arith.constant 0 : i32
    return %arg0, %arg2 : i32, i32
  }
  func.func @transform_1(%arg0: i32, %arg1: i32, %arg2: i32) -> (i32, i32) {
    %c0_i32 = arith.constant 0 : i32
    return %arg2, %arg1 : i32, i32
  }
  func.func @transform_2(%arg0: i32, %arg1: i32, %arg2: i32) -> (i32, i32) {
    %c0_i32 = arith.constant 0 : i32
    %c0_i32_0 = arith.constant 0 : i32
    return %c0_i32, %arg1 : i32, i32
  }
  func.func @transform_3(%arg0: i32, %arg1: i32, %arg2: i32) -> (i32, i32) {
    %c0_i32 = arith.constant 0 : i32
    %c0_i32_0 = arith.constant 0 : i32
    return %c0_i32, %arg1 : i32, i32
  }
  func.func @transform_4(%arg0: i32, %arg1: i32, %arg2: i32) -> (i32, i32) {
    %c0_i32 = arith.constant 0 : i32
    return %arg0, %arg1 : i32, i32
  }
}

module attributes {stable_mosaic.version = 11 : i64} {
  func.func @_conv_bn_res_add_relu_kernel(%arg0: i32, %arg1: i32, %arg2: i32, %arg3: memref<64x72xbf16, #tpu.memory_space<vmem>>, %arg4: memref<72x128xbf16, #tpu.memory_space<vmem>>, %arg5: memref<1x128xf32, #tpu.memory_space<vmem>>, %arg6: memref<1x128xf32, #tpu.memory_space<vmem>>, %arg7: memref<64x128xbf16, #tpu.memory_space<vmem>>, %arg8: memref<64x128xbf16, #tpu.memory_space<vmem>>, %arg9: memref<64x128xf32, #tpu.memory_space<vmem>>) attributes {dimension_semantics = [#tpu.dimension_semantics<parallel>, #tpu.dimension_semantics<parallel>, #tpu.dimension_semantics<arbitrary>], iteration_bounds = array<i64: 2, 1, 1>, scalar_prefetch = 0 : i64, scratch_operands = 1 : i64, tpu.core_type = #tpu.core_type<tc>, window_params = [{transform_indices = @transform_0, window_bounds = array<i64: 64, 72>}, {transform_indices = @transform_1, window_bounds = array<i64: 72, 128>}, {transform_indices = @transform_2, window_bounds = array<i64: 1, 128>}, {transform_indices = @transform_3, window_bounds = array<i64: 1, 128>}, {transform_indices = @transform_4, window_bounds = array<i64: 64, 128>}, {transform_indices = @transform_5, window_bounds = array<i64: 64, 128>}]} {
    %c0_i32 = arith.constant 0 : i32
    %0 = arith.cmpi eq, %arg2, %c0_i32 : i32
    %1 = arith.extui %0 : i1 to i32
    %c0_i32_0 = arith.constant 0 : i32
    %2 = arith.cmpi ne, %1, %c0_i32_0 : i32
    scf.if %2 {
      %cst_10 = arith.constant 0.000000e+00 : f32
      %12 = vector.broadcast %cst_10 : f32 to vector<64x128xf32>
      %c0_11 = arith.constant 0 : index
      %c0_12 = arith.constant 0 : index
      %13 = vector.load %arg9[%c0_11, %c0_12] : memref<64x128xf32, #tpu.memory_space<vmem>>, vector<64x128xf32>
      tpu.vector_store %arg9[%c0_11, %c0_12], %12 {strides = array<i32>} : memref<64x128xf32, #tpu.memory_space<vmem>>, vector<64x128xf32>,
    } else {
    }
    %c0 = arith.constant 0 : index
    %c0_1 = arith.constant 0 : index
    %3 = vector.load %arg9[%c0, %c0_1] : memref<64x128xf32, #tpu.memory_space<vmem>>, vector<64x128xf32>
    %c0_2 = arith.constant 0 : index
    %c0_3 = arith.constant 0 : index
    %4 = vector.load %arg3[%c0_2, %c0_3] : memref<64x72xbf16, #tpu.memory_space<vmem>>, vector<64x72xbf16>
    %c0_4 = arith.constant 0 : index
    %c0_5 = arith.constant 0 : index
    %5 = vector.load %arg4[%c0_4, %c0_5] : memref<72x128xbf16, #tpu.memory_space<vmem>>, vector<72x128xbf16>
    %cst = arith.constant dense<0.000000e+00> : vector<64x128xf32>
    %6 = tpu.matmul %4, %5, %cst {dimension_numbers = #tpu.dot_dimension_numbers<[1], [0], [0], [1], [0, 0, 1, 1], [], []>} : vector<64x72xbf16>, vector<72x128xbf16>, vector<64x128xf32> -> vector<64x128xf32>
    %7 = arith.addf %3, %6 : vector<64x128xf32>
    %c0_6 = arith.constant 0 : index
    %c0_7 = arith.constant 0 : index
    %8 = vector.load %arg9[%c0_6, %c0_7] : memref<64x128xf32, #tpu.memory_space<vmem>>, vector<64x128xf32>
    tpu.vector_store %arg9[%c0_6, %c0_7], %7 {strides = array<i32>} : memref<64x128xf32, #tpu.memory_space<vmem>>, vector<64x128xf32>,
    %c0_i32_8 = arith.constant 0 : i32
    %9 = arith.cmpi eq, %arg2, %c0_i32_8 : i32
    %10 = arith.extui %9 : i1 to i32
    %c0_i32_9 = arith.constant 0 : i32
    %11 = arith.cmpi ne, %10, %c0_i32_9 : i32
    scf.if %11 {
      %c0_10 = arith.constant 0 : index
      %c0_11 = arith.constant 0 : index
      %12 = vector.load %arg9[%c0_10, %c0_11] : memref<64x128xf32, #tpu.memory_space<vmem>>, vector<64x128xf32>
      %c0_12 = arith.constant 0 : index
      %c0_13 = arith.constant 0 : index
      %13 = vector.load %arg5[%c0_12, %c0_13] : memref<1x128xf32, #tpu.memory_space<vmem>>, vector<1x128xf32>
      %14 = vector.broadcast %13 : vector<1x128xf32> to vector<64x128xf32>
      %15 = arith.mulf %12, %14 : vector<64x128xf32>
      %c0_14 = arith.constant 0 : index
      %c0_15 = arith.constant 0 : index
      %16 = vector.load %arg6[%c0_14, %c0_15] : memref<1x128xf32, #tpu.memory_space<vmem>>, vector<1x128xf32>
      %17 = vector.broadcast %16 : vector<1x128xf32> to vector<64x128xf32>
      %18 = arith.addf %15, %17 : vector<64x128xf32>
      %c0_16 = arith.constant 0 : index
      %c0_17 = arith.constant 0 : index
      %19 = vector.load %arg7[%c0_16, %c0_17] : memref<64x128xbf16, #tpu.memory_space<vmem>>, vector<64x128xbf16>
      %20 = arith.extf %19 : vector<64x128xbf16> to vector<64x128xf32>
      %21 = arith.addf %18, %20 : vector<64x128xf32>
      %cst_18 = arith.constant 0.000000e+00 : f32
      %22 = vector.broadcast %cst_18 : f32 to vector<64x128xf32>
      %23 = arith.maximumf %21, %22 : vector<64x128xf32>
      %24 = arith.truncf %23 : vector<64x128xf32> to vector<64x128xbf16>
      %c0_19 = arith.constant 0 : index
      %c0_20 = arith.constant 0 : index
      %25 = vector.load %arg8[%c0_19, %c0_20] : memref<64x128xbf16, #tpu.memory_space<vmem>>, vector<64x128xbf16>
      tpu.vector_store %arg8[%c0_19, %c0_20], %24 {strides = array<i32>} : memref<64x128xbf16, #tpu.memory_space<vmem>>, vector<64x128xbf16>,
    } else {
    }
    return
  }
  func.func @transform_0(%arg0: i32, %arg1: i32, %arg2: i32) -> (i32, i32) {
    %c0_i32 = arith.constant 0 : i32
    return %arg0, %arg2 : i32, i32
  }
  func.func @transform_1(%arg0: i32, %arg1: i32, %arg2: i32) -> (i32, i32) {
    %c0_i32 = arith.constant 0 : i32
    return %arg2, %arg1 : i32, i32
  }
  func.func @transform_2(%arg0: i32, %arg1: i32, %arg2: i32) -> (i32, i32) {
    %c0_i32 = arith.constant 0 : i32
    %c0_i32_0 = arith.constant 0 : i32
    return %c0_i32, %arg1 : i32, i32
  }
  func.func @transform_3(%arg0: i32, %arg1: i32, %arg2: i32) -> (i32, i32) {
    %c0_i32 = arith.constant 0 : i32
    %c0_i32_0 = arith.constant 0 : i32
    return %c0_i32, %arg1 : i32, i32
  }
  func.func @transform_4(%arg0: i32, %arg1: i32, %arg2: i32) -> (i32, i32) {
    %c0_i32 = arith.constant 0 : i32
    return %arg0, %arg1 : i32, i32
  }
  func.func @transform_5(%arg0: i32, %arg1: i32, %arg2: i32) -> (i32, i32) {
    %c0_i32 = arith.constant 0 : i32
    return %arg0, %arg1 : i32, i32
  }
}

</mosaic_0001>

<bundles_post_ra>
// kernel: fwd.4
= control target key start
LH: loop header
LB: loop body
LE: loop exit
PB: predicated region body
PF: predicated region fallthrough
CT: control target
= control target key end

     0   :  { %s854_s15 = smov 0   ;;  %s856_s16 = smov 0   ;;  %s909_s0 = inlined_call_operand.vmem [shape: bf16[128,36], index: 0, kind: input, shape index: {}]   ;;  %s910_s1 = inlined_call_operand.vmem [shape: bf16[36,128], index: 1, kind: input, shape index: {}]   ;;  %s911_s2 = inlined_call_operand.vmem [shape: f32[1,128], index: 2, kind: input, shape index: {}]   ;;  %s912_s3 = inlined_call_operand.vmem [shape: f32[1,128], index: 3, kind: input, shape index: {}]   ;;  %s913_s4 = inlined_call_operand.vmem [shape: bf16[128,128], index: 4, kind: output, shape index: {}]  }
   0x1   :  { %s858_s17 = smov 0  }
   0x2 LB: > { %s33_s18 = sadd.s32 1, %s823_s16  ;;  %p686_p0 = scmp.ge.s32.totalorder %s827_s17, 1  ;;  %s827_s17 = sphi %s858_s17, %s14_s17   ;;  %s823_s16 = sphi %s856_s16, %s915_s16   ;;  %s819_s15 = sphi %s854_s15, %s914_s15  }
   0x3   : > { %p35_p1 = scmp.ge.s32.totalorder %s33_s18, 2  ;;  %p221_p2 = scmp.lt.s32.totalorder %s827_s17, 3 }
   0x5   : > { %s917_s18 = smov (%p35_p1, %s33_s18), 0  ;;  %p222_p3 = pnand %p686_p0, %p221_p2 }
   0x6   : > { %v798_v0 = vld [vmem:[%s910_s1] sm:$0xff] (!%p222_p3)   ;;  %v799_v1 = vld [vmem:[%s910_s1 + $0x8] sm:$0xff] (!%p222_p3)   ;;  %s687_s23 = sshll.u32 (!%p222_p3), %s819_s15, 3  ;;  %v800_v2 = vld [vmem:[%s910_s1 + $0x10] ss:$0 sps:$4 sm:$0x33] (!%p222_p3)  }
   0x7   : > { %225 = sbr.rel (%p222_p3) target bundleno = 243 (0xf3), region = 36  ;;  %752 = vmatprep.subr.bf16.mxu0 (!%p222_p3), %v798_v0  ;;  %766 = vmatprep.subr.bf16.mxu1 (!%p222_p3), %v798_v0  ;;  %p268_p4 = scmp.lt.s32.totalorder (!%p222_p3), %s687_s23, 15  ;;  %vm382_vm0 = vcmask (!%p222_p3), 1041408   ;;  %vm369_vm1 = vcmask (!%p222_p3), 293888   ;;  %v702_v8 = vld [vmem:[%s911_s2] ss:$0 sm:$0xff] (!%p222_p3) }
   0x8   : > { %753 = vmatpush3.bf16.msra.mxu0 (!%p222_p3), %v798_v0  ;;  %769 = vmatpush3.bf16.msra.mxu1 (!%p222_p3), %v798_v0  ;;  %v384_v3 = vsel (!%p222_p3), %vm382_vm0, %v800_v2, 0  ;;  %v703_v10 = vld [vmem:[%s912_s3] ss:$0 sm:$0xff] (!%p222_p3) }
   0x9   : > { %754 = vmatprep.subr.bf16.mxu0 (!%p222_p3), %v799_v1  ;;  %767 = vmatprep.subr.bf16.mxu1 (!%p222_p3), %v799_v1 }
   0xc   : > { %755 = vmatpush3.bf16.msra.mxu0 (!%p222_p3), %v799_v1  ;;  %770 = vmatpush3.bf16.msra.mxu1 (!%p222_p3), %v799_v1 }
   0xd   : > { %772 = vmatprep.subr.msk.bf16.mxu0 (!%p222_p3), %vm382_vm0, %v800_v2  ;;  %773 = vmatprep.subr.msk.bf16.mxu1 (!%p222_p3), %vm382_vm0, %v800_v2 }
   0xe   : > { %s919_s23 = smov (!%p268_p4, %s687_s23), 15 }
   0xf   : > { %s688_s26 = sshll.u32 %s919_s23, 2 }
  0x10   : > { %s274_s29 = scalar_lea.vmem %s909_s0, %s688_s26  ;;  %757 = vmatpush3.bf16.msra.mxu0 %v384_v3  ;;  %771 = vmatpush3.bf16.msra.mxu1 %v384_v3  ;;  %s298_s10 = scalar_lea.vmem %s913_s4, %s688_s26 }
  0x11   : > { %v801_v4 = vld [vmem:[%s274_s29] sm:$0xff]   ;;  %v802_v5 = vld [vmem:[%s274_s29 + $0x10] sm:$0xff]   ;;  %v803_v6 = vld [vmem:[%s274_s29 + $0x8] sm:$0xff]  }
  0x12   : > { %758 = vmatprep.mubr.msk.bf16.mxu0 %vm369_vm1, %v801_v4  ;;  %v804_v7 = vld [vmem:[%s274_s29 + $0x18] sm:$0xff]   ;;  %762 = vmatprep.mubr.msk.bf16.mxu1 %vm369_vm1, %v802_v5 }
  0x13   : > { %759 = vmatmul.mubr.msk.bf16.vlgmr.msra.gmra.mrb[0].mxu0 %vm369_vm1, %v803_v6  ;;  %763 = vmatmul.mubr.msk.bf16.vlgmr.msra.gmra.mrb[0].mxu1 %vm369_vm1, %v804_v7 }
  0xe6   : > { %v760_v9 = vpop.f32.mrb[0].mxu0  ;;  %v764_v11 = vpop.f32.mrb[0].mxu1 }
  0xe7   : > { %v487_v12 = vmul.f32 %v760_v9, %v702_v8  ;;  %v491_v13 = vmul.f32 %v764_v11, %v702_v8  ;;  %v420_v14 = vpop.f32.mrb[1].mxu0  ;;  %v436_v15 = vpop.f32.mrb[1].mxu1 }
  0xe8   : > { %v485_v16 = vmul.f32 %v702_v8, %v420_v14  ;;  %v489_v17 = vmul.f32 %v702_v8, %v436_v15  ;;  %v761_v18 = vpop.f32.mrb[2].mxu0  ;;  %v765_v19 = vpop.f32.mrb[2].mxu1 }
  0xe9   : > { %v502_v20 = vadd.f32 %v703_v10, %v487_v12  ;;  %v506_v21 = vadd.f32 %v703_v10, %v491_v13  ;;  %v488_v22 = vmul.f32 %v761_v18, %v702_v8  ;;  %v492_v23 = vmul.f32 %v765_v19, %v702_v8  ;;  %v423_v24 = vpop.f32.mrb[3].mxu0  ;;  %v439_v25 = vpop.f32.mrb[3].mxu1 }
  0xea   : > { %v500_v26 = vadd.f32 %v703_v10, %v485_v16  ;;  %v504_v27 = vadd.f32 %v703_v10, %v489_v17  ;;  %v486_v28 = vmul.f32 %v702_v8, %v423_v24  ;;  %v490_v29 = vmul.f32 %v702_v8, %v439_v25 }
  0xeb   : > { %v503_v30 = vadd.f32 %v703_v10, %v488_v22  ;;  %v507_v31 = vadd.f32 %v703_v10, %v492_v23  ;;  %v510_v34 = vmax.f32 %v502_v20, 0.0  ;;  %v514_v35 = vmax.f32 %v506_v21, 0.0 }
  0xec   : > { %v501_v32 = vadd.f32 %v703_v10, %v486_v28  ;;  %v505_v33 = vadd.f32 %v703_v10, %v490_v29  ;;  %v508_v38 = vmax.f32 %v500_v26, 0.0  ;;  %v512_v39 = vmax.f32 %v504_v27, 0.0 }
  0xed   : > { %v511_v36 = vmax.f32 %v503_v30, 0.0  ;;  %v515_v37 = vmax.f32 %v507_v31, 0.0 }
  0xee   : > { %v509_v40 = vmax.f32 %v501_v32, 0.0  ;;  %v513_v41 = vmax.f32 %v505_v33, 0.0 }
  0xef   : > { %v730_v42 = vpack.c.bf16 %v511_v36, %v510_v34  ;;  %v740_v43 = vpack.c.bf16 %v515_v37, %v514_v35 }
  0xf0   : > { %v725_v44 = vpack.c.bf16 %v509_v40, %v508_v38  ;;  %v735_v45 = vpack.c.bf16 %v513_v41, %v512_v39 }
  0xf1   : > { %742 = vst [vmem:[%s298_s10 + $0x8] sm:$0xff] %v730_v42   ;;  %744 = vst [vmem:[%s298_s10 + $0x18] sm:$0xff] %v740_v43  }
  0xf2   : > { %726 = vst [vmem:[%s298_s10] sm:$0xff] %v725_v44   ;;  %743 = vst [vmem:[%s298_s10 + $0x10] sm:$0xff] %v735_v45  }
  0xf3 PF: > { %s14_s17 = sadd.s32 1, %s827_s17   ;;  %s914_s15 = smov %s823_s16 }
  0xf4   : > { %p11_p5 = scmp.ge.s32.totalorder %s14_s17, 4   ;;  %s915_s16 = smov %s917_s18 }
  0xf6   :  { %13 = sbr.rel (!%p11_p5) target bundleno = 2 (0x2), region = 83 }

// kernel: fwd.6
= control target key start
LH: loop header
LB: loop body
LE: loop exit
PB: predicated region body
PF: predicated region fallthrough
CT: control target
= control target key end

     0   :  { %s884_s15 = smov 0   ;;  %s886_s16 = smov 0   ;;  %s949_s0 = inlined_call_operand.vmem [shape: bf16[128,72], index: 0, kind: input, shape index: {}]   ;;  %s950_s1 = inlined_call_operand.vmem [shape: bf16[72,128], index: 1, kind: input, shape index: {}]   ;;  %s951_s2 = inlined_call_operand.vmem [shape: f32[1,128], index: 2, kind: input, shape index: {}]   ;;  %s952_s3 = inlined_call_operand.vmem [shape: f32[1,128], index: 3, kind: input, shape index: {}]   ;;  %s953_s4 = inlined_call_operand.vmem [shape: bf16[128,128], index: 4, kind: output, shape index: {}]  }
   0x1   :  { %s888_s17 = smov 0  }
   0x2 LB: > { %s33_s18 = sadd.s32 1, %s853_s16  ;;  %p702_p0 = scmp.ge.s32.totalorder %s857_s17, 1  ;;  %s857_s17 = sphi %s888_s17, %s14_s17   ;;  %s853_s16 = sphi %s886_s16, %s955_s16   ;;  %s849_s15 = sphi %s884_s15, %s954_s15  }
   0x3   : > { %p35_p1 = scmp.ge.s32.totalorder %s33_s18, 2  ;;  %p221_p2 = scmp.lt.s32.totalorder %s857_s17, 3 }
   0x5   : > { %s957_s18 = smov (%p35_p1, %s33_s18), 0  ;;  %p222_p3 = pnand %p702_p0, %p221_p2 }
   0x6   : > { %v826_v0 = vld [vmem:[%s950_s1] sm:$0xff] (!%p222_p3)   ;;  %v827_v1 = vld [vmem:[%s950_s1 + $0x8] sm:$0xff] (!%p222_p3)   ;;  %s703_s23 = sshll.u32 (!%p222_p3), %s849_s15, 3  ;;  %v828_v2 = vld [vmem:[%s950_s1 + $0x10] sm:$0xff] (!%p222_p3)   ;;  %vm385_vm0 = vcmask (!%p222_p3), 588800   ;;  %vm398_vm1 = vcmask (!%p222_p3), 1043456  }
   0x7   : > { %225 = sbr.rel (%p222_p3) target bundleno = 251 (0xfb), region = 36  ;;  %772 = vmatprep.subr.bf16.mxu0 (!%p222_p3), %v826_v0  ;;  %790 = vmatprep.subr.bf16.mxu1 (!%p222_p3), %v826_v0  ;;  %p268_p4 = scmp.lt.s32.totalorder (!%p222_p3), %s703_s23, 15  ;;  %v829_v3 = vld [vmem:[%s950_s1 + $0x18] sm:$0xff] (!%p222_p3)   ;;  %v830_v6 = vld [vmem:[%s950_s1 + $0x20] ss:$0 sps:$4 sm:$0xff] (!%p222_p3)  }
   0x8   : > { %773 = vmatpush3.bf16.msra.mxu0 (!%p222_p3), %v826_v0  ;;  %795 = vmatpush3.bf16.msra.mxu1 (!%p222_p3), %v826_v0  ;;  %v400_v7 = vsel (!%p222_p3), %vm398_vm1, %v830_v6, 0  ;;  %v720_v10 = vld [vmem:[%s951_s2] ss:$0 sm:$0xff] (!%p222_p3) }
   0x9   : > { %774 = vmatprep.subr.bf16.mxu0 (!%p222_p3), %v827_v1  ;;  %791 = vmatprep.subr.bf16.mxu1 (!%p222_p3), %v827_v1  ;;  %v721_v12 = vld [vmem:[%s952_s3] ss:$0 sm:$0xff] (!%p222_p3) }
   0xc   : > { %775 = vmatpush3.bf16.msra.mxu0 (!%p222_p3), %v827_v1  ;;  %796 = vmatpush3.bf16.msra.mxu1 (!%p222_p3), %v827_v1 }
   0xd   : > { %776 = vmatprep.subr.bf16.mxu0 (!%p222_p3), %v828_v2  ;;  %792 = vmatprep.subr.bf16.mxu1 (!%p222_p3), %v828_v2 }
   0xe   : > { %s959_s23 = smov (!%p268_p4, %s703_s23), 15 }
   0xf   : > { %s704_s26 = sshll.u32 %s959_s23, 2 }
  0x10   : > { %s274_s5 = scalar_lea.vmem %s949_s0, %s704_s26  ;;  %777 = vmatpush3.bf16.msra.mxu0 %v828_v2  ;;  %797 = vmatpush3.bf16.msra.mxu1 %v828_v2  ;;  %s298_s14 = scalar_lea.vmem %s953_s4, %s704_s26 }
  0x11   : > { %v831_v4 = vld [vmem:[%s274_s5] sm:$0xff]   ;;  %v832_v5 = vld [vmem:[%s274_s5 + $0x10] sm:$0xff]   ;;  %778 = vmatprep.subr.bf16.mxu0 %v829_v3  ;;  %793 = vmatprep.subr.bf16.mxu1 %v829_v3  ;;  %v833_v8 = vld [vmem:[%s274_s5 + $0x8] sm:$0xff]  }
  0x12   : > { %782 = vmatprep.mubr.msk.bf16.mxu0 %vm385_vm0, %v831_v4  ;;  %786 = vmatprep.mubr.msk.bf16.mxu1 %vm385_vm0, %v832_v5  ;;  %v834_v9 = vld [vmem:[%s274_s5 + $0x18] sm:$0xff]  }
  0x14   : > { %779 = vmatpush3.bf16.msra.mxu0 %v829_v3  ;;  %798 = vmatpush3.bf16.msra.mxu1 %v829_v3 }
  0x15   : > { %800 = vmatprep.subr.msk.bf16.mxu0 %vm398_vm1, %v830_v6  ;;  %801 = vmatprep.subr.msk.bf16.mxu1 %vm398_vm1, %v830_v6 }
  0x18   : > { %781 = vmatpush3.bf16.msra.mxu0 %v400_v7  ;;  %799 = vmatpush3.bf16.msra.mxu1 %v400_v7 }
  0x1b   : > { %783 = vmatmul.mubr.msk.bf16.vlgmr.msra.gmra.mrb[0].mxu0 %vm385_vm0, %v833_v8  ;;  %787 = vmatmul.mubr.msk.bf16.vlgmr.msra.gmra.mrb[0].mxu1 %vm385_vm0, %v834_v9 }
  0xee   : > { %v784_v11 = vpop.f32.mrb[0].mxu0  ;;  %v788_v13 = vpop.f32.mrb[0].mxu1 }
  0xef   : > { %v503_v14 = vmul.f32 %v784_v11, %v720_v10  ;;  %v507_v15 = vmul.f32 %v788_v13, %v720_v10  ;;  %v436_v16 = vpop.f32.mrb[1].mxu0  ;;  %v452_v17 = vpop.f32.mrb[1].mxu1 }
  0xf0   : > { %v501_v18 = vmul.f32 %v720_v10, %v436_v16  ;;  %v505_v19 = vmul.f32 %v720_v10, %v452_v17  ;;  %v785_v20 = vpop.f32.mrb[2].mxu0  ;;  %v789_v21 = vpop.f32.mrb[2].mxu1 }
  0xf1   : > { %v518_v22 = vadd.f32 %v721_v12, %v503_v14  ;;  %v522_v23 = vadd.f32 %v721_v12, %v507_v15  ;;  %v504_v24 = vmul.f32 %v785_v20, %v720_v10  ;;  %v508_v25 = vmul.f32 %v789_v21, %v720_v10  ;;  %v439_v26 = vpop.f32.mrb[3].mxu0  ;;  %v455_v27 = vpop.f32.mrb[3].mxu1 }
  0xf2   : > { %v516_v28 = vadd.f32 %v721_v12, %v501_v18  ;;  %v520_v29 = vadd.f32 %v721_v12, %v505_v19  ;;  %v502_v30 = vmul.f32 %v720_v10, %v439_v26  ;;  %v506_v31 = vmul.f32 %v720_v10, %v455_v27 }
  0xf3   : > { %v519_v32 = vadd.f32 %v721_v12, %v504_v24  ;;  %v523_v33 = vadd.f32 %v721_v12, %v508_v25  ;;  %v526_v36 = vmax.f32 %v518_v22, 0.0  ;;  %v530_v37 = vmax.f32 %v522_v23, 0.0 }
  0xf4   : > { %v517_v34 = vadd.f32 %v721_v12, %v502_v30  ;;  %v521_v35 = vadd.f32 %v721_v12, %v506_v31  ;;  %v524_v40 = vmax.f32 %v516_v28, 0.0  ;;  %v528_v41 = vmax.f32 %v520_v29, 0.0 }
  0xf5   : > { %v527_v38 = vmax.f32 %v519_v32, 0.0  ;;  %v531_v39 = vmax.f32 %v523_v33, 0.0 }
  0xf6   : > { %v525_v42 = vmax.f32 %v517_v34, 0.0  ;;  %v529_v43 = vmax.f32 %v521_v35, 0.0 }
  0xf7   : > { %v748_v44 = vpack.c.bf16 %v527_v38, %v526_v36  ;;  %v758_v45 = vpack.c.bf16 %v531_v39, %v530_v37 }
  0xf8   : > { %v743_v46 = vpack.c.bf16 %v525_v42, %v524_v40  ;;  %v753_v47 = vpack.c.bf16 %v529_v43, %v528_v41 }
  0xf9   : > { %760 = vst [vmem:[%s298_s14 + $0x8] sm:$0xff] %v748_v44   ;;  %762 = vst [vmem:[%s298_s14 + $0x18] sm:$0xff] %v758_v45  }
  0xfa   : > { %744 = vst [vmem:[%s298_s14] sm:$0xff] %v743_v46   ;;  %761 = vst [vmem:[%s298_s14 + $0x10] sm:$0xff] %v753_v47  }
  0xfb PF: > { %s14_s17 = sadd.s32 1, %s857_s17   ;;  %s954_s15 = smov %s853_s16 }
  0xfc   : > { %p11_p5 = scmp.ge.s32.totalorder %s14_s17, 4   ;;  %s955_s16 = smov %s957_s18 }
  0xfe   :  { %13 = sbr.rel (!%p11_p5) target bundleno = 2 (0x2), region = 83 }

// kernel: fwd.5
= control target key start
LH: loop header
LB: loop body
LE: loop exit
PB: predicated region body
PF: predicated region fallthrough
CT: control target
= control target key end

     0   :  { %s1330_s27 = smov 0   ;;  %s1332_s28 = smov 0   ;;  %s1418_s0 = inlined_call_operand.vmem [shape: bf16[128,72], index: 0, kind: input, shape index: {}]   ;;  %s1419_s1 = inlined_call_operand.vmem [shape: bf16[72,128], index: 1, kind: input, shape index: {}]   ;;  %s1420_s2 = inlined_call_operand.vmem [shape: f32[1,128], index: 2, kind: input, shape index: {}]   ;;  %s1421_s3 = inlined_call_operand.vmem [shape: f32[1,128], index: 3, kind: input, shape index: {}]   ;;  %s1422_s4 = inlined_call_operand.vmem [shape: bf16[128,4], index: 4, kind: input, shape index: {}]   ;;  %s1423_s5 = inlined_call_operand.vmem [shape: bf16[4,128], index: 5, kind: input, shape index: {}]   ;;  %s1424_s6 = inlined_call_operand.vmem [shape: f32[1,128], index: 6, kind: input, shape index: {}]   ;;  %s1425_s7 = inlined_call_operand.vmem [shape: f32[1,128], index: 7, kind: input, shape index: {}]   ;;  %s1426_s8 = inlined_call_operand.vmem [shape: bf16[128,128], index: 8, kind: output, shape index: {}]  }
   0x1   :  { %s1334_s29 = smov 0  }
   0x2 LB: > { %s37_s30 = sadd.s32 1, %s1279_s28  ;;  %p1096_p0 = scmp.ge.s32.totalorder %s1283_s29, 1  ;;  %s1283_s29 = sphi %s1334_s29, %s18_s29   ;;  %s1279_s28 = sphi %s1332_s28, %s1428_s28   ;;  %s1275_s27 = sphi %s1330_s27, %s1427_s27  }
   0x3   : > { %p39_p1 = scmp.ge.s32.totalorder %s37_s30, 2  ;;  %p357_p2 = scmp.lt.s32.totalorder %s1283_s29, 3 }
   0x5   : > { %s1430_s30 = smov (%p39_p1, %s37_s30), 0  ;;  %p358_p3 = pnand %p1096_p0, %p357_p2 }
   0x6   : > { %v1248_v0 = vld [vmem:[%s1419_s1] sm:$0xff] (!%p358_p3)   ;;  %vm530_vm0 = vcmask (!%p358_p3), 1041408   ;;  %v1249_v3 = vld [vmem:[%s1419_s1 + $0x8] sm:$0xff] (!%p358_p3)   ;;  %s1097_s15 = sshll.u32 (!%p358_p3), %s1275_s27, 3  ;;  %v1252_v4 = vld [vmem:[%s1419_s1 + $0x10] sm:$0xff] (!%p358_p3)   ;;  %vm517_vm1 = vcmask (!%p358_p3), 31744  }
   0x7   : > { %361 = sbr.rel (%p358_p3) target bundleno = 265 (0x109), region = 52  ;;  %v496_v1 = vld [vmem:[%s1423_s5] sm:$0x3] (!%p358_p3)  ;;  %1211 = vmatprep.subr.bf16.mxu1 (!%p358_p3), %v1248_v0  ;;  %p427_p4 = scmp.lt.s32.totalorder (!%p358_p3), %s1097_s15, 15  ;;  %v1253_v5 = vld [vmem:[%s1419_s1 + $0x18] sm:$0xff] (!%p358_p3)   ;;  %vm709_vm2 = vcmask (!%p358_p3), 588800  }
   0x8   : > { %1221 = vmatprep.subr.msk.bf16.mxu0 (!%p358_p3), %vm530_vm0, %v496_v1  ;;  %v532_v2 = vsel (!%p358_p3), %vm530_vm0, %v496_v1, 0  ;;  %1216 = vmatpush3.bf16.msra.mxu1 (!%p358_p3), %v1248_v0  ;;  %v1256_v8 = vld [vmem:[%s1419_s1 + $0x20] ss:$0 sps:$4 sm:$0xff] (!%p358_p3)   ;;  %vm722_vm3 = vcmask (!%p358_p3), 1043456  }
   0x9   : > { %1184 = vmatpush3.bf16.msra.mxu0 (!%p358_p3), %v532_v2  ;;  %1212 = vmatprep.subr.bf16.mxu1 (!%p358_p3), %v1249_v3  ;;  %v724_v12 = vsel (!%p358_p3), %vm722_vm3, %v1256_v8, 0  ;;  %v1111_v20 = vld [vmem:[%s1424_s6] ss:$0 sm:$0xff] (!%p358_p3) }
   0xa   : > { %1193 = vmatprep.subr.bf16.mxu0 (!%p358_p3), %v1248_v0  ;;  %v1126_v22 = vld [vmem:[%s1420_s2] ss:$0 sm:$0xff] (!%p358_p3) }
   0xb   : > { %v1112_v25 = vld [vmem:[%s1425_s7] ss:$0 sm:$0xff] (!%p358_p3) }
   0xc   : > { %1217 = vmatpush3.bf16.msra.mxu1 (!%p358_p3), %v1249_v3  ;;  %v1127_v29 = vld [vmem:[%s1421_s3] ss:$0 sm:$0xff] (!%p358_p3) }
   0xd   : > { %1213 = vmatprep.subr.bf16.mxu1 (!%p358_p3), %v1252_v4 }
   0xe   : > { %s1432_s15 = smov (!%p427_p4, %s1097_s15), 15 }
   0xf   : > { %s1360_s18 = sshll.u32 %s1432_s15, 2 }
  0x10   : > { %s454_s21 = scalar_lea.vmem %s1422_s4, %s1360_s18  ;;  %s433_s9 = scalar_lea.vmem %s1418_s0, %s1360_s18  ;;  %1218 = vmatpush3.bf16.msra.mxu1 %v1252_v4 }
  0x11   : > { %v1250_v6 = vld [vmem:[%s454_s21] sm:$0xff]   ;;  %v1251_v7 = vld [vmem:[%s454_s21 + $0x8] sm:$0xff]   ;;  %v1254_v9 = vld [vmem:[%s454_s21 + $0x10] sm:$0xff]   ;;  %1214 = vmatprep.subr.bf16.mxu1 %v1253_v5 }
  0x12   : > { %1185 = vmatprep.mubr.msk.bf16.mxu0 %vm517_vm1, %v1250_v6  ;;  %v1257_v10 = vld [vmem:[%s433_s9 + $0x10] sm:$0xff]   ;;  %v1255_v11 = vld [vmem:[%s454_s21 + $0x18] sm:$0xff]   ;;  %v1259_v13 = vld [vmem:[%s433_s9] sm:$0xff]   ;;  %s1403_s21 = scalar_lea.vmem %s1426_s8, %s1360_s18 }
  0x13   : > { %1186 = vmatmul.mubr.msk.bf16.vlgmr.msra.gmra.mrb[0].mxu0 %vm517_vm1, %v1251_v7  ;;  %1207 = vmatprep.mubr.msk.bf16.mxu1 %vm709_vm2, %v1257_v10  ;;  %v1258_v14 = vld [vmem:[%s433_s9 + $0x18] sm:$0xff]   ;;  %v1260_v15 = vld [vmem:[%s433_s9 + $0x8] sm:$0xff]  }
  0x14   : > { %1194 = vmatpush3.bf16.msra.mxu0 %v1248_v0  ;;  %1189 = vmatprep.mubr.msk.bf16.mxu0 %vm517_vm1, %v1254_v9 }
  0x15   : > { %1195 = vmatprep.subr.bf16.mxu0 %v1249_v3  ;;  %1219 = vmatpush3.bf16.msra.mxu1 %v1253_v5 }
  0x16   : > { %1223 = vmatprep.subr.msk.bf16.mxu1 %vm722_vm3, %v1256_v8 }
  0x18   : > { %1196 = vmatpush3.bf16.msra.mxu0 %v1249_v3 }
  0x19   : > { %1197 = vmatprep.subr.bf16.mxu0 %v1252_v4  ;;  %1220 = vmatpush3.bf16.msra.mxu1 %v724_v12 }
  0x1b   : > { %1190 = vmatmul.mubr.msk.bf16.gmra.mrb[4].mxu0 %vm517_vm1, %v1255_v11 }
  0x1c   : > { %1198 = vmatpush3.bf16.msra.mxu0 %v1252_v4  ;;  %1203 = vmatprep.mubr.msk.bf16.mxu0 %vm709_vm2, %v1259_v13 }
  0x1d   : > { %1199 = vmatprep.subr.bf16.mxu0 %v1253_v5  ;;  %1208 = vmatmul.mubr.msk.bf16.vlgmr.msra.gmra.mrb[0].mxu1 %vm709_vm2, %v1258_v14 }
  0x20   : > { %1200 = vmatpush3.bf16.msra.mxu0 %v1253_v5 }
  0x21   : > { %1222 = vmatprep.subr.msk.bf16.mxu0 %vm722_vm3, %v1256_v8 }
  0x24   : > { %1202 = vmatpush3.bf16.msra.mxu0 %v724_v12 }
  0x27   : > { %1204 = vmatmul.mubr.msk.bf16.vlgmr.msra.gmra.mrb[8].mxu0 %vm709_vm2, %v1260_v15 }
  0xe6   : > { %v1187_v16 = vpop.f32.mrb[0].mxu0 }
  0xe7   : > { %v568_v17 = vpop.f32.mrb[1].mxu0  ;;  %v608_v52 = vmul.f32 %v1187_v16, %v1111_v20 }
  0xe8   : > { %v1188_v18 = vpop.f32.mrb[2].mxu0  ;;  %v606_v55 = vmul.f32 %v1111_v20, %v568_v17 }
  0xe9   : > { %v571_v19 = vpop.f32.mrb[3].mxu0  ;;  %v609_v59 = vmul.f32 %v1188_v18, %v1111_v20  ;;  %v623_v3 = vadd.f32 %v1112_v25, %v608_v52 }
  0xea   : > { %v607_v63 = vmul.f32 %v1111_v20, %v571_v19  ;;  %v621_v7 = vadd.f32 %v1112_v25, %v606_v55 }
  0xeb   : > { %v624_v10 = vadd.f32 %v1112_v25, %v609_v59 }
  0xec   : > { %v622_v13 = vadd.f32 %v1112_v25, %v607_v63 }
  0xee   : > { %v1191_v21 = vpop.f32.mrb[4].mxu0 }
  0xef   : > { %v612_v23 = vmul.f32 %v1191_v21, %v1111_v20  ;;  %v584_v24 = vpop.f32.mrb[5].mxu0 }
  0xf0   : > { %v610_v26 = vmul.f32 %v1111_v20, %v584_v24  ;;  %v1192_v27 = vpop.f32.mrb[6].mxu0  ;;  %v1209_v28 = vpop.f32.mrb[0].mxu1 }
  0xf1   : > { %v627_v30 = vadd.f32 %v1112_v25, %v612_v23  ;;  %v613_v31 = vmul.f32 %v1192_v27, %v1111_v20  ;;  %v587_v32 = vpop.f32.mrb[7].mxu0  ;;  %v831_v33 = vmul.f32 %v1209_v28, %v1126_v22  ;;  %v776_v34 = vpop.f32.mrb[1].mxu1 }
  0xf2   : > { %v611_v35 = vmul.f32 %v1111_v20, %v587_v32  ;;  %v829_v36 = vmul.f32 %v1126_v22, %v776_v34  ;;  %v1210_v37 = vpop.f32.mrb[2].mxu1  ;;  %v625_v41 = vadd.f32 %v1112_v25, %v610_v26 }
  0xf3   : > { %v846_v38 = vadd.f32 %v1127_v29, %v831_v33  ;;  %v832_v39 = vmul.f32 %v1210_v37, %v1126_v22  ;;  %v779_v40 = vpop.f32.mrb[3].mxu1  ;;  %v628_v44 = vadd.f32 %v1112_v25, %v613_v31 }
  0xf4   : > { %v844_v42 = vadd.f32 %v1127_v29, %v829_v36  ;;  %v830_v43 = vmul.f32 %v1126_v22, %v779_v40  ;;  %v626_v47 = vadd.f32 %v1112_v25, %v611_v35 }
  0xf5   : > { %v862_v45 = vadd.f32 %v846_v38, %v627_v30  ;;  %v847_v46 = vadd.f32 %v1127_v29, %v832_v39 }
  0xf6   : > { %v860_v48 = vadd.f32 %v844_v42, %v625_v41  ;;  %v845_v49 = vadd.f32 %v1127_v29, %v830_v43 }
  0xf7   : > { %v863_v50 = vadd.f32 %v847_v46, %v628_v44  ;;  %v870_v53 = vmax.f32 %v862_v45, 0.0 }
  0xf8   : > { %v861_v51 = vadd.f32 %v845_v49, %v626_v47  ;;  %v868_v56 = vmax.f32 %v860_v48, 0.0 }
  0xf9   : > { %v871_v54 = vmax.f32 %v863_v50, 0.0 }
  0xfa   : > { %v869_v57 = vmax.f32 %v861_v51, 0.0  ;;  %v1205_v58 = vpop.f32.mrb[8].mxu0 }
  0xfb   : > { %v1164_v60 = vpack.c.bf16 %v871_v54, %v870_v53  ;;  %v827_v61 = vmul.f32 %v1205_v58, %v1126_v22  ;;  %v760_v62 = vpop.f32.mrb[9].mxu0 }
  0xfc   : > { %v1159_v0 = vpack.c.bf16 %v869_v57, %v868_v56  ;;  %v825_v1 = vmul.f32 %v1126_v22, %v760_v62  ;;  %v1206_v2 = vpop.f32.mrb[10].mxu0 }
  0xfd   : > { %1168 = vst [vmem:[%s1403_s21 + $0x18] sm:$0xff] %v1164_v60   ;;  %v842_v4 = vadd.f32 %v1127_v29, %v827_v61  ;;  %v828_v5 = vmul.f32 %v1206_v2, %v1126_v22  ;;  %v763_v6 = vpop.f32.mrb[11].mxu0 }
  0xfe   : > { %1167 = vst [vmem:[%s1403_s21 + $0x10] sm:$0xff] %v1159_v0   ;;  %v840_v8 = vadd.f32 %v1127_v29, %v825_v1  ;;  %v826_v9 = vmul.f32 %v1126_v22, %v763_v6 }
  0xff   : > { %v858_v11 = vadd.f32 %v842_v4, %v623_v3  ;;  %v843_v12 = vadd.f32 %v1127_v29, %v828_v5 }
 0x100   : > { %v856_v14 = vadd.f32 %v840_v8, %v621_v7  ;;  %v841_v15 = vadd.f32 %v1127_v29, %v826_v9 }
 0x101   : > { %v859_v16 = vadd.f32 %v843_v12, %v624_v10  ;;  %v866_v18 = vmax.f32 %v858_v11, 0.0 }
 0x102   : > { %v857_v17 = vadd.f32 %v841_v15, %v622_v13  ;;  %v864_v20 = vmax.f32 %v856_v14, 0.0 }
 0x103   : > { %v867_v19 = vmax.f32 %v859_v16, 0.0 }
 0x104   : > { %v865_v21 = vmax.f32 %v857_v17, 0.0 }
 0x105   : > { %v1154_v23 = vpack.c.bf16 %v867_v19, %v866_v18 }
 0x106   : > { %v1149_v24 = vpack.c.bf16 %v865_v21, %v864_v20 }
 0x107   : > { %1166 = vst [vmem:[%s1403_s21 + $0x8] sm:$0xff] %v1154_v23  }
 0x108   : > { %1150 = vst [vmem:[%s1403_s21] sm:$0xff] %v1149_v24  }
 0x109 PF: > { %s18_s29 = sadd.s32 1, %s1283_s29   ;;  %s1427_s27 = smov %s1279_s28 }
 0x10a   : > { %p15_p5 = scmp.ge.s32.totalorder %s18_s29, 4   ;;  %s1428_s28 = smov %s1430_s30 }
 0x10c   :  { %17 = sbr.rel (!%p15_p5) target bundleno = 2 (0x2), region = 111 }

// kernel: fwd.7
= control target key start
LH: loop header
LB: loop body
LE: loop exit
PB: predicated region body
PF: predicated region fallthrough
CT: control target
= control target key end

     0   :  { %s1009_s18 = smov 0   ;;  %s1011_s19 = smov 0   ;;  %s1075_s0 = inlined_call_operand.vmem [shape: bf16[128,72], index: 0, kind: input, shape index: {}]   ;;  %s1076_s1 = inlined_call_operand.vmem [shape: bf16[72,128], index: 1, kind: input, shape index: {}]   ;;  %s1077_s2 = inlined_call_operand.vmem [shape: f32[1,128], index: 2, kind: input, shape index: {}]   ;;  %s1078_s3 = inlined_call_operand.vmem [shape: f32[1,128], index: 3, kind: input, shape index: {}]   ;;  %s1079_s4 = inlined_call_operand.vmem [shape: bf16[128,128], index: 4, kind: input, shape index: {}]   ;;  %s1080_s5 = inlined_call_operand.vmem [shape: bf16[128,128], index: 5, kind: output, shape index: {}]  }
   0x1   :  { %s1013_s20 = smov 0  }
   0x2 LB: > { %s34_s21 = sadd.s32 1, %s973_s19  ;;  %p801_p0 = scmp.ge.s32.totalorder %s977_s20, 1  ;;  %s977_s20 = sphi %s1013_s20, %s15_s20   ;;  %s973_s19 = sphi %s1011_s19, %s1082_s19   ;;  %s969_s18 = sphi %s1009_s18, %s1081_s18  }
   0x3   : > { %p36_p1 = scmp.ge.s32.totalorder %s34_s21, 2  ;;  %p262_p2 = scmp.lt.s32.totalorder %s977_s20, 3 }
   0x5   : > { %s1084_s21 = smov (%p36_p1, %s34_s21), 0  ;;  %p263_p3 = pnand %p801_p0, %p262_p2 }
   0x6   : > { %v946_v0 = vld [vmem:[%s1076_s1] sm:$0xff] (!%p263_p3)   ;;  %v947_v1 = vld [vmem:[%s1076_s1 + $0x8] sm:$0xff] (!%p263_p3)   ;;  %s802_s26 = sshll.u32 (!%p263_p3), %s969_s18, 3  ;;  %v948_v2 = vld [vmem:[%s1076_s1 + $0x10] sm:$0xff] (!%p263_p3)   ;;  %vm445_vm0 = vcmask (!%p263_p3), 588800   ;;  %vm458_vm1 = vcmask (!%p263_p3), 1043456  }
   0x7   : > { %266 = sbr.rel (%p263_p3) target bundleno = 253 (0xfd), region = 40  ;;  %892 = vmatprep.subr.bf16.mxu0 (!%p263_p3), %v946_v0  ;;  %910 = vmatprep.subr.bf16.mxu1 (!%p263_p3), %v946_v0  ;;  %p319_p4 = scmp.lt.s32.totalorder (!%p263_p3), %s802_s26, 15  ;;  %v949_v3 = vld [vmem:[%s1076_s1 + $0x18] sm:$0xff] (!%p263_p3)   ;;  %v950_v6 = vld [vmem:[%s1076_s1 + $0x20] ss:$0 sps:$4 sm:$0xff] (!%p263_p3)  }
   0x8   : > { %893 = vmatpush3.bf16.msra.mxu0 (!%p263_p3), %v946_v0  ;;  %915 = vmatpush3.bf16.msra.mxu1 (!%p263_p3), %v946_v0  ;;  %v460_v7 = vsel (!%p263_p3), %vm458_vm1, %v950_v6, 0  ;;  %v821_v14 = vld [vmem:[%s1077_s2] ss:$0 sm:$0xff] (!%p263_p3) }
   0x9   : > { %894 = vmatprep.subr.bf16.mxu0 (!%p263_p3), %v947_v1  ;;  %911 = vmatprep.subr.bf16.mxu1 (!%p263_p3), %v947_v1  ;;  %v822_v16 = vld [vmem:[%s1078_s3] ss:$0 sm:$0xff] (!%p263_p3) }
   0xc   : > { %895 = vmatpush3.bf16.msra.mxu0 (!%p263_p3), %v947_v1  ;;  %916 = vmatpush3.bf16.msra.mxu1 (!%p263_p3), %v947_v1 }
   0xd   : > { %896 = vmatprep.subr.bf16.mxu0 (!%p263_p3), %v948_v2  ;;  %912 = vmatprep.subr.bf16.mxu1 (!%p263_p3), %v948_v2 }
   0xe   : > { %s1086_s26 = smov (!%p319_p4, %s802_s26), 15 }
   0xf   : > { %s1036_s29 = sshll.u32 %s1086_s26, 2 }
  0x10   : > { %s325_s9 = scalar_lea.vmem %s1075_s0, %s1036_s29  ;;  %897 = vmatpush3.bf16.msra.mxu0 %v948_v2  ;;  %917 = vmatpush3.bf16.msra.mxu1 %v948_v2  ;;  %s349_s14 = scalar_lea.vmem %s1079_s4, %s1036_s29 }
  0x11   : > { %v951_v4 = vld [vmem:[%s325_s9] sm:$0xff]   ;;  %v952_v5 = vld [vmem:[%s325_s9 + $0x10] sm:$0xff]   ;;  %898 = vmatprep.subr.bf16.mxu0 %v949_v3  ;;  %913 = vmatprep.subr.bf16.mxu1 %v949_v3  ;;  %v953_v8 = vld [vmem:[%s325_s9 + $0x8] sm:$0xff]   ;;  %s358_s24 = scalar_lea.vmem %s1080_s5, %s1036_s29 }
  0x12   : > { %902 = vmatprep.mubr.msk.bf16.mxu0 %vm445_vm0, %v951_v4  ;;  %906 = vmatprep.mubr.msk.bf16.mxu1 %vm445_vm0, %v952_v5  ;;  %v954_v9 = vld [vmem:[%s325_s9 + $0x18] sm:$0xff]   ;;  %v877_v10 = vld [vmem:[%s349_s14 + $0x8] sm:$0xff]   ;;  %v842_v12 = vld [vmem:[%s349_s14] sm:$0xff]  }
  0x13   : > { %v879_v11 = vld [vmem:[%s349_s14 + $0x18] sm:$0xff]   ;;  %v878_v13 = vld [vmem:[%s349_s14 + $0x10] sm:$0xff]   ;;  %v847_v17 = vunpack.c.l.bf16 %v877_v10  ;;  %v843_v20 = vunpack.c.l.bf16 %v842_v12  ;;  %v848_v26 = vunpack.c.h.bf16 %v877_v10  ;;  %v844_v32 = vunpack.c.h.bf16 %v842_v12 }
  0x14   : > { %899 = vmatpush3.bf16.msra.mxu0 %v949_v3  ;;  %918 = vmatpush3.bf16.msra.mxu1 %v949_v3  ;;  %v855_v19 = vunpack.c.l.bf16 %v879_v11  ;;  %v851_v21 = vunpack.c.l.bf16 %v878_v13  ;;  %v856_v27 = vunpack.c.h.bf16 %v879_v11  ;;  %v852_v33 = vunpack.c.h.bf16 %v878_v13 }
  0x15   : > { %920 = vmatprep.subr.msk.bf16.mxu0 %vm458_vm1, %v950_v6  ;;  %921 = vmatprep.subr.msk.bf16.mxu1 %vm458_vm1, %v950_v6 }
  0x18   : > { %901 = vmatpush3.bf16.msra.mxu0 %v460_v7  ;;  %919 = vmatpush3.bf16.msra.mxu1 %v460_v7 }
  0x1b   : > { %903 = vmatmul.mubr.msk.bf16.vlgmr.msra.gmra.mrb[0].mxu0 %vm445_vm0, %v953_v8  ;;  %907 = vmatmul.mubr.msk.bf16.vlgmr.msra.gmra.mrb[0].mxu1 %vm445_vm0, %v954_v9 }
  0xee   : > { %v904_v15 = vpop.f32.mrb[0].mxu0  ;;  %v908_v18 = vpop.f32.mrb[0].mxu1 }
  0xef   : > { %v563_v22 = vmul.f32 %v904_v15, %v821_v14  ;;  %v567_v23 = vmul.f32 %v908_v18, %v821_v14  ;;  %v496_v24 = vpop.f32.mrb[1].mxu0  ;;  %v512_v25 = vpop.f32.mrb[1].mxu1 }
  0xf0   : > { %v561_v28 = vmul.f32 %v821_v14, %v496_v24  ;;  %v565_v29 = vmul.f32 %v821_v14, %v512_v25  ;;  %v905_v30 = vpop.f32.mrb[2].mxu0  ;;  %v909_v31 = vpop.f32.mrb[2].mxu1 }
  0xf1   : > { %v578_v34 = vadd.f32 %v822_v16, %v563_v22  ;;  %v582_v35 = vadd.f32 %v822_v16, %v567_v23  ;;  %v564_v36 = vmul.f32 %v905_v30, %v821_v14  ;;  %v568_v37 = vmul.f32 %v909_v31, %v821_v14  ;;  %v499_v38 = vpop.f32.mrb[3].mxu0  ;;  %v515_v39 = vpop.f32.mrb[3].mxu1 }
  0xf2   : > { %v576_v40 = vadd.f32 %v822_v16, %v561_v28  ;;  %v580_v41 = vadd.f32 %v822_v16, %v565_v29  ;;  %v562_v42 = vmul.f32 %v821_v14, %v499_v38  ;;  %v566_v43 = vmul.f32 %v821_v14, %v515_v39 }
  0xf3   : > { %v602_v44 = vadd.f32 %v847_v17, %v578_v34  ;;  %v606_v45 = vadd.f32 %v855_v19, %v582_v35  ;;  %v579_v46 = vadd.f32 %v822_v16, %v564_v36  ;;  %v583_v47 = vadd.f32 %v822_v16, %v568_v37 }
  0xf4   : > { %v600_v48 = vadd.f32 %v843_v20, %v576_v40  ;;  %v604_v49 = vadd.f32 %v851_v21, %v580_v41  ;;  %v577_v50 = vadd.f32 %v822_v16, %v562_v42  ;;  %v581_v51 = vadd.f32 %v822_v16, %v566_v43 }
  0xf5   : > { %v603_v52 = vadd.f32 %v848_v26, %v579_v46  ;;  %v607_v53 = vadd.f32 %v856_v27, %v583_v47  ;;  %v610_v56 = vmax.f32 %v602_v44, 0.0  ;;  %v614_v57 = vmax.f32 %v606_v45, 0.0 }
  0xf6   : > { %v601_v54 = vadd.f32 %v844_v32, %v577_v50  ;;  %v605_v55 = vadd.f32 %v852_v33, %v581_v51  ;;  %v608_v60 = vmax.f32 %v600_v48, 0.0  ;;  %v612_v61 = vmax.f32 %v604_v49, 0.0 }
  0xf7   : > { %v611_v58 = vmax.f32 %v603_v52, 0.0  ;;  %v615_v59 = vmax.f32 %v607_v53, 0.0 }
  0xf8   : > { %v609_v62 = vmax.f32 %v601_v54, 0.0  ;;  %v613_v63 = vmax.f32 %v605_v55, 0.0 }
  0xf9   : > { %v865_v0 = vpack.c.bf16 %v611_v58, %v610_v56  ;;  %v875_v1 = vpack.c.bf16 %v615_v59, %v614_v57 }
  0xfa   : > { %v860_v2 = vpack.c.bf16 %v609_v62, %v608_v60  ;;  %v870_v3 = vpack.c.bf16 %v613_v63, %v612_v61 }
  0xfb   : > { %880 = vst [vmem:[%s358_s24 + $0x8] sm:$0xff] %v865_v0   ;;  %882 = vst [vmem:[%s358_s24 + $0x18] sm:$0xff] %v875_v1  }
  0xfc   : > { %861 = vst [vmem:[%s358_s24] sm:$0xff] %v860_v2   ;;  %881 = vst [vmem:[%s358_s24 + $0x10] sm:$0xff] %v870_v3  }
  0xfd PF: > { %s15_s20 = sadd.s32 1, %s977_s20   ;;  %s1081_s18 = smov %s973_s19 }
  0xfe   : > { %p12_p5 = scmp.ge.s32.totalorder %s15_s20, 4   ;;  %s1082_s19 = smov %s1084_s21 }
 0x100   :  { %14 = sbr.rel (!%p12_p5) target bundleno = 2 (0x2), region = 90 }

</bundles_post_ra>
